<compile_context>
chip_gen: v6e
topology: v6e:2x2x1
jax: 0.10.0
libtpu: 0.0.40
codegen_flags: <defaults>
</compile_context>

<pallas_src>
import jax
import jax.numpy as jnp
from jax.experimental import pallas as pl
from jax.experimental.pallas import tpu as pltpu

INPUT_SIZE = 784
HIDDEN = 100
NUM_CLASSES = 10

HID_PAD = 128     # hidden width padded to one lane-tile
OUT_PAD = 128     # lane-dense output block; sliced to 10 in the wrapper


def mlp_kernel(x_ref, w1_ref, b1_ref, w2_ref, b2_ref, w3_ref, b3_ref, o_ref):
    """One (TILE_B, 784) f32 batch tile through fc1+ReLU, fc2+ReLU, fc3."""
    # Cast to bf16 in-kernel (no separate wrapper pass over x in HBM).
    x = x_ref[...].astype(jnp.bfloat16)                              # (TB, 784)

    h1 = jnp.dot(x, w1_ref[...], preferred_element_type=jnp.float32)
    h1 = jnp.maximum(h1 + b1_ref[...], 0.0).astype(jnp.bfloat16)     # (TB, 128) bf16

    h2 = jnp.dot(h1, w2_ref[...], preferred_element_type=jnp.float32)
    h2 = jnp.maximum(h2 + b2_ref[...], 0.0).astype(jnp.bfloat16)     # (TB, 128) bf16

    out = jnp.dot(h2, w3_ref[...], preferred_element_type=jnp.float32)
    o_ref[...] = (out + b3_ref[...]).astype(o_ref.dtype)             # (TB, 128) f32


def _pick_tile_b(B):
    """Small batches: multiple-of-16 tile (no padding waste, bf16-sublane ok).
    Large batches: 512 rows/step amortizes per-grid-step overhead; VMEM use
    stays < 5 MiB and the 'parallel' axis still splits across v7x's 2 TCs
    once B >= 1024."""
    for t in (16, 32, 64, 128, 256):
        if B <= t:
            return t
    return 512


@jax.jit
def nn_forward(x, padded_params):
    w1, b1, w2, b2, w3, b3 = padded_params
    B = x.shape[0]
    tile_b = _pick_tile_b(B)
    B_pad = pl.cdiv(B, tile_b) * tile_b

    # Only the batch dim ever gets padded (and only when B isn't a tile
    # multiple); the 784 feature dim is consumed as-is by the kernel.
    xp = x if B_pad == B else jnp.pad(x, ((0, B_pad - B), (0, 0)))

    const = lambda shape: pl.BlockSpec(shape, lambda i: (0,) * len(shape))

    out_padded = pl.pallas_call(
        mlp_kernel,
        out_shape=jax.ShapeDtypeStruct((B_pad, OUT_PAD), jnp.float32),
        grid=(B_pad // tile_b,),
        in_specs=[
            pl.BlockSpec((tile_b, INPUT_SIZE), lambda i: (i, 0)),   # x tile (f32)
            const(w1.shape), const(b1.shape),                       # weights/bias
            const(w2.shape), const(b2.shape),                       # stay VMEM-
            const(w3.shape), const(b3.shape),                       # resident
        ],
        out_specs=pl.BlockSpec((tile_b, OUT_PAD), lambda i: (i, 0)),
        compiler_params=pltpu.CompilerParams(
            dimension_semantics=("parallel",),   # megacore sharding on v7x
            vmem_limit_bytes=32 << 20,           # safe on v5e/v6e/v7x
        ),
    )(xp, w1, b1, w2, b2, w3, b3)

    return out_padded[:B, :NUM_CLASSES]


def init_params(key):
    """PyTorch nn.Linear-style init (uniform +-1/sqrt(fan_in)), stored (in, out)."""
    def linear(key, fan_in, fan_out):
        kw, kb = jax.random.split(key)
        bound = 1.0 / jnp.sqrt(fan_in)
        w = jax.random.uniform(kw, (fan_in, fan_out), jnp.float32, -bound, bound)
        b = jax.random.uniform(kb, (1, fan_out), jnp.float32, -bound, bound)
        return w, b

    k1, k2, k3 = jax.random.split(key, 3)
    w1, b1 = linear(k1, INPUT_SIZE, HIDDEN)
    w2, b2 = linear(k2, HIDDEN, HIDDEN)
    w3, b3 = linear(k3, HIDDEN, NUM_CLASSES)
    return (w1, b1, w2, b2, w3, b3)


def prepare_params(params):
    """Zero-pad hidden/output dims to 128; weights -> bf16, biases stay f32.
    Padded hidden lanes compute ReLU(0)=0 exactly and hit zero w-rows, padded
    output lanes are exactly 0 and sliced off, so padding is numerically exact."""
    w1, b1, w2, b2, w3, b3 = params

    def pad2(a, rows, cols):
        return jnp.pad(a, ((0, rows - a.shape[0]), (0, cols - a.shape[1])))

    return (
        pad2(w1, INPUT_SIZE, HID_PAD).astype(jnp.bfloat16),   # (784, 128)
        pad2(b1, 1, HID_PAD),
        pad2(w2, HID_PAD, HID_PAD).astype(jnp.bfloat16),      # (128, 128)
        pad2(b2, 1, HID_PAD),
        pad2(w3, HID_PAD, OUT_PAD).astype(jnp.bfloat16),      # (128, 128)
        pad2(b3, 1, OUT_PAD),
    )


def reference_forward_f32(x, params):
    w1, b1, w2, b2, w3, b3 = params
    h1 = jnp.maximum(x @ w1 + b1, 0.0)
    h2 = jnp.maximum(h1 @ w2 + b2, 0.0)
    return h2 @ w3 + b3


def reference_forward_bf16(x, params):
    """Emulates the kernel's bf16-input / f32-accumulate numerics."""
    w1, b1, w2, b2, w3, b3 = params
    c = lambda a: a.astype(jnp.bfloat16).astype(jnp.float32)
    h1 = jnp.maximum(jnp.dot(c(x), c(w1)) + b1, 0.0)
    h2 = jnp.maximum(jnp.dot(c(h1), c(w2)) + b2, 0.0)
    return jnp.dot(c(h2), c(w3)) + b3


if __name__ == "__main__":
    key = jax.random.PRNGKey(0)
    kx, kp = jax.random.split(key)

    batch = 8
    x = jax.random.normal(kx, (batch, INPUT_SIZE), jnp.float32)
    params = init_params(kp)
    padded_params = prepare_params(params)

    out = nn_forward(x, padded_params)
    out = jax.block_until_ready(out)
    assert out.shape == (batch, NUM_CLASSES)

    # Tight check vs a reference with matching bf16-input numerics.
    ref_bf16 = reference_forward_bf16(x, params)
    assert jnp.allclose(out, ref_bf16, atol=2e-3, rtol=2e-3), "mismatch vs bf16 reference"

    # Looser semantic check vs the full-f32 PyTorch-equivalent forward.
    ref_f32 = reference_forward_f32(x, params)
    assert jnp.allclose(out, ref_f32, atol=3e-2, rtol=3e-2), "mismatch vs f32 reference"

    print("KERNEL_OK")
</pallas_src>

<mosaic_0001>
module attributes {stable_mosaic.version = 11 : i64} {
  func.func @mlp_kernel(%arg0: i32, %arg1: memref<16x784xf32, #tpu.memory_space<vmem>>, %arg2: memref<784x128xbf16, #tpu.memory_space<vmem>>, %arg3: memref<1x128xf32, #tpu.memory_space<vmem>>, %arg4: memref<128x128xbf16, #tpu.memory_space<vmem>>, %arg5: memref<1x128xf32, #tpu.memory_space<vmem>>, %arg6: memref<128x128xbf16, #tpu.memory_space<vmem>>, %arg7: memref<1x128xf32, #tpu.memory_space<vmem>>, %arg8: memref<16x128xf32, #tpu.memory_space<vmem>>) attributes {dimension_semantics = [#tpu.dimension_semantics<parallel>], iteration_bounds = array<i64: 1>, scalar_prefetch = 0 : i64, scratch_operands = 0 : i64, tpu.core_type = #tpu.core_type<tc>, window_params = [{transform_indices = @transform_0, window_bounds = array<i64: 16, 784>}, {pipeline_mode = #tpu.pipeline_mode<synchronous>, transform_indices = @transform_1, window_bounds = array<i64: 784, 128>}, {pipeline_mode = #tpu.pipeline_mode<synchronous>, transform_indices = @transform_2, window_bounds = array<i64: 1, 128>}, {pipeline_mode = #tpu.pipeline_mode<synchronous>, transform_indices = @transform_3, window_bounds = array<i64: 128, 128>}, {pipeline_mode = #tpu.pipeline_mode<synchronous>, transform_indices = @transform_4, window_bounds = array<i64: 1, 128>}, {pipeline_mode = #tpu.pipeline_mode<synchronous>, transform_indices = @transform_5, window_bounds = array<i64: 128, 128>}, {pipeline_mode = #tpu.pipeline_mode<synchronous>, transform_indices = @transform_6, window_bounds = array<i64: 1, 128>}, {transform_indices = @transform_7, window_bounds = array<i64: 16, 128>}]} {
    %c0 = arith.constant 0 : index
    %c0_0 = arith.constant 0 : index
    %0 = vector.load %arg1[%c0, %c0_0] : memref<16x784xf32, #tpu.memory_space<vmem>>, vector<16x784xf32>
    %1 = arith.truncf %0 : vector<16x784xf32> to vector<16x784xbf16>
    %c0_1 = arith.constant 0 : index
    %c0_2 = arith.constant 0 : index
    %2 = vector.load %arg2[%c0_1, %c0_2] : memref<784x128xbf16, #tpu.memory_space<vmem>>, vector<784x128xbf16>
    %cst = arith.constant dense<0.000000e+00> : vector<16x128xf32>
    %3 = tpu.matmul %1, %2, %cst {dimension_numbers = #tpu.dot_dimension_numbers<[1], [0], [0], [1], [0, 0, 1, 1], [], []>} : vector<16x784xbf16>, vector<784x128xbf16>, vector<16x128xf32> -> vector<16x128xf32>
    %c0_3 = arith.constant 0 : index
    %c0_4 = arith.constant 0 : index
    %4 = vector.load %arg3[%c0_3, %c0_4] : memref<1x128xf32, #tpu.memory_space<vmem>>, vector<1x128xf32>
    %5 = vector.broadcast %4 : vector<1x128xf32> to vector<16x128xf32>
    %6 = arith.addf %3, %5 : vector<16x128xf32>
    %cst_5 = arith.constant 0.000000e+00 : f32
    %7 = vector.broadcast %cst_5 : f32 to vector<16x128xf32>
    %8 = arith.maximumf %6, %7 : vector<16x128xf32>
    %9 = arith.truncf %8 : vector<16x128xf32> to vector<16x128xbf16>
    %c0_6 = arith.constant 0 : index
    %c0_7 = arith.constant 0 : index
    %10 = vector.load %arg4[%c0_6, %c0_7] : memref<128x128xbf16, #tpu.memory_space<vmem>>, vector<128x128xbf16>
    %cst_8 = arith.constant dense<0.000000e+00> : vector<16x128xf32>
    %11 = tpu.matmul %9, %10, %cst_8 {dimension_numbers = #tpu.dot_dimension_numbers<[1], [0], [0], [1], [0, 0, 1, 1], [], []>} : vector<16x128xbf16>, vector<128x128xbf16>, vector<16x128xf32> -> vector<16x128xf32>
    %c0_9 = arith.constant 0 : index
    %c0_10 = arith.constant 0 : index
    %12 = vector.load %arg5[%c0_9, %c0_10] : memref<1x128xf32, #tpu.memory_space<vmem>>, vector<1x128xf32>
    %13 = vector.broadcast %12 : vector<1x128xf32> to vector<16x128xf32>
    %14 = arith.addf %11, %13 : vector<16x128xf32>
    %cst_11 = arith.constant 0.000000e+00 : f32
    %15 = vector.broadcast %cst_11 : f32 to vector<16x128xf32>
    %16 = arith.maximumf %14, %15 : vector<16x128xf32>
    %17 = arith.truncf %16 : vector<16x128xf32> to vector<16x128xbf16>
    %c0_12 = arith.constant 0 : index
    %c0_13 = arith.constant 0 : index
    %18 = vector.load %arg6[%c0_12, %c0_13] : memref<128x128xbf16, #tpu.memory_space<vmem>>, vector<128x128xbf16>
    %cst_14 = arith.constant dense<0.000000e+00> : vector<16x128xf32>
    %19 = tpu.matmul %17, %18, %cst_14 {dimension_numbers = #tpu.dot_dimension_numbers<[1], [0], [0], [1], [0, 0, 1, 1], [], []>} : vector<16x128xbf16>, vector<128x128xbf16>, vector<16x128xf32> -> vector<16x128xf32>
    %c0_15 = arith.constant 0 : index
    %c0_16 = arith.constant 0 : index
    %20 = vector.load %arg7[%c0_15, %c0_16] : memref<1x128xf32, #tpu.memory_space<vmem>>, vector<1x128xf32>
    %21 = vector.broadcast %20 : vector<1x128xf32> to vector<16x128xf32>
    %22 = arith.addf %19, %21 : vector<16x128xf32>
    %c0_17 = arith.constant 0 : index
    %c0_18 = arith.constant 0 : index
    %23 = vector.load %arg8[%c0_17, %c0_18] : memref<16x128xf32, #tpu.memory_space<vmem>>, vector<16x128xf32>
    tpu.vector_store %arg8[%c0_17, %c0_18], %22 {strides = array<i32>} : memref<16x128xf32, #tpu.memory_space<vmem>>, vector<16x128xf32>,
    return
  }
  func.func @transform_0(%arg0: i32) -> (i32, i32) {
    %c0_i32 = arith.constant 0 : i32
    %c0_i32_0 = arith.constant 0 : i32
    return %arg0, %c0_i32 : i32, i32
  }
  func.func @transform_1(%arg0: i32) -> (i32, i32) {
    %c0_i32 = arith.constant 0 : i32
    %c0_i32_0 = arith.constant 0 : i32
    %c0_i32_1 = arith.constant 0 : i32
    return %c0_i32, %c0_i32_0 : i32, i32
  }
  func.func @transform_2(%arg0: i32) -> (i32, i32) {
    %c0_i32 = arith.constant 0 : i32
    %c0_i32_0 = arith.constant 0 : i32
    %c0_i32_1 = arith.constant 0 : i32
    return %c0_i32, %c0_i32_0 : i32, i32
  }
  func.func @transform_3(%arg0: i32) -> (i32, i32) {
    %c0_i32 = arith.constant 0 : i32
    %c0_i32_0 = arith.constant 0 : i32
    %c0_i32_1 = arith.constant 0 : i32
    return %c0_i32, %c0_i32_0 : i32, i32
  }
  func.func @transform_4(%arg0: i32) -> (i32, i32) {
    %c0_i32 = arith.constant 0 : i32
    %c0_i32_0 = arith.constant 0 : i32
    %c0_i32_1 = arith.constant 0 : i32
    return %c0_i32, %c0_i32_0 : i32, i32
  }
  func.func @transform_5(%arg0: i32) -> (i32, i32) {
    %c0_i32 = arith.constant 0 : i32
    %c0_i32_0 = arith.constant 0 : i32
    %c0_i32_1 = arith.constant 0 : i32
    return %c0_i32, %c0_i32_0 : i32, i32
  }
  func.func @transform_6(%arg0: i32) -> (i32, i32) {
    %c0_i32 = arith.constant 0 : i32
    %c0_i32_0 = arith.constant 0 : i32
    %c0_i32_1 = arith.constant 0 : i32
    return %c0_i32, %c0_i32_0 : i32, i32
  }
  func.func @transform_7(%arg0: i32) -> (i32, i32) {
    %c0_i32 = arith.constant 0 : i32
    %c0_i32_0 = arith.constant 0 : i32
    return %arg0, %c0_i32 : i32, i32
  }
}

</mosaic_0001>

<bundles_post_ra>
// kernel: nn_forward.1
= control target key start
LH: loop header
LB: loop body
LE: loop exit
PB: predicated region body
PF: predicated region fallthrough
CT: control target
= control target key end

     0   :  { %12 = vsyncpa [#allocation3], 0  ;;  %s1159_s24 = smov [#allocation2]   ;;  %s1335_s0 = inlined_call_operand.vmem [shape: f32[16,784], index: 0, kind: input, shape index: {}]   ;;  %s1336_s1 = inlined_call_operand.hbm [shape: bf16[784,128], index: 1, kind: input, shape index: {}]   ;;  %s1337_s2 = inlined_call_operand.vmem [shape: f32[1,128], index: 2, kind: input, shape index: {}]   ;;  %s1338_s3 = inlined_call_operand.vmem [shape: bf16[128,128], index: 3, kind: input, shape index: {}]   ;;  %s1339_s4 = inlined_call_operand.vmem [shape: f32[1,128], index: 4, kind: input, shape index: {}]   ;;  %s1340_s5 = inlined_call_operand.vmem [shape: bf16[128,128], index: 5, kind: input, shape index: {}]   ;;  %s1341_s6 = inlined_call_operand.vmem [shape: f32[1,128], index: 6, kind: input, shape index: {}]   ;;  %s1342_s7 = inlined_call_operand.vmem [shape: f32[16,128], index: 7, kind: output, shape index: {}]  }
   0x1   :  { %s20_s25 = sshll.u32 %s1159_s24, 4  ;;  %s21_s25 = int_to_ptr.vmem [resolvable:$true] %s20_s25 }
   0x2   :  { %s1145_s26 = scalar_lea.vmem %s21_s25, 6272  ;;  %p1150_p1 = scmp.lt.s32.totalorder %s21_s25, %s21_s25 }
   0x3   :  { %p1146_p0 = scmp.ne.s32.totalorder %s21_s25, %s1145_s26  ;;  %p1151_p2 = scmp.lt.s32.totalorder %s1145_s26, %s1145_s26 }
   0x5   :  { %p1152_p3 = por %p1151_p2, %p1150_p1 }
   0x7   :  { %p1153_p4 = pnand %p1152_p3, %p1146_p0 }
   0x9   :  { %1156 = shalt.err (!%p1153_p4)
}
   0xa   :  { %s1160_s27 = smov 64   ;;  %s1161_s28 = smov 4  }
   0xb   :  { %26 = dma.hbm_to_vmem [thread:$0]  %s1336_s1, 6272, %s21_s25, [#allocation3], %s1160_s27, %s1160_s27, %s1161_s28  }
   0xc   :  { %1157 = dma.done.wait [#allocation3], 6272  }
   0xd   :  { %1158 = vsyncadd [#allocation3], 4294961024  ;;  %v1072_v0 = vld [vmem:[#allocation2 + $0x78] sm:$0xff]   ;;  %v1076_v4 = vld [vmem:[#allocation2 + $0x70] sm:$0xff]   ;;  %v1162_v43 = vmov 0.0   ;;  %vm1163_vm0 = vmmov 0  }
   0xe   :  { %v1073_v1 = vld [vmem:[#allocation2 + $0x38] sm:$0xff]   ;;  %935 = vmatprep.subr.bf16.mxu0 %v1072_v0  ;;  %v1077_v5 = vld [vmem:[#allocation2 + $0x30] sm:$0xff]   ;;  %v1080_v8 = vld [vmem:[#allocation2 + $0x68] sm:$0xff]   ;;  %vm461_vm1 = vcmask 130048  }
   0xf   :  { %v1074_v2 = vld [vmem:[#allocation2 + $0xf8] sm:$0xff]   ;;  %936 = vmatpush3.bf16.msra.mxu0 %v1073_v1  ;;  %v1078_v6 = vld [vmem:[#allocation2 + $0xf0] sm:$0xff]   ;;  %v1081_v9 = vld [vmem:[#allocation2 + $0x28] sm:$0xff]  }
  0x10   :  { %v1075_v3 = vld [vmem:[#allocation2 + $0xb8] sm:$0xff]   ;;  %957 = vmatprep.subr.bf16.mxu1 %v1074_v2  ;;  %937 = vmatprep.subr.bf16.mxu0 %v1076_v4  ;;  %v1079_v7 = vld [vmem:[#allocation2 + $0xb0] sm:$0xff]   ;;  %v1082_v10 = vld [vmem:[#allocation2 + $0xe8] sm:$0xff]  }
  0x11   :  { %958 = vmatpush3.bf16.msra.mxu1 %v1075_v3  ;;  %v1083_v11 = vld [vmem:[#allocation2 + $0xa8] sm:$0xff]   ;;  %v1084_v12 = vld [vmem:[#allocation2 + $0x60] sm:$0xff]   ;;  %v1088_v16 = vld [vmem:[#allocation2 + $0x58] sm:$0xff]  }
  0x12   :  { %959 = vmatprep.subr.bf16.mxu1 %v1078_v6  ;;  %v1085_v13 = vld [vmem:[#allocation2 + $0x20] sm:$0xff]   ;;  %v1089_v17 = vld [vmem:[#allocation2 + $0x18] sm:$0xff]   ;;  %v1092_v20 = vld [vmem:[#allocation2 + $0x50] sm:$0xff]  }
  0x13   :  { %938 = vmatpush3.bf16.msra.mxu0 %v1077_v5  ;;  %v1086_v14 = vld [vmem:[#allocation2 + $0xe0] sm:$0xff]   ;;  %v1090_v18 = vld [vmem:[#allocation2 + $0xd8] sm:$0xff]   ;;  %v1093_v21 = vld [vmem:[#allocation2 + $0x10] sm:$0xff]  }
  0x14   :  { %939 = vmatprep.subr.bf16.mxu0 %v1080_v8  ;;  %v1087_v15 = vld [vmem:[#allocation2 + $0xa0] sm:$0xff]   ;;  %v1091_v19 = vld [vmem:[#allocation2 + $0x98] sm:$0xff]   ;;  %v1094_v22 = vld [vmem:[#allocation2 + $0xd0] sm:$0xff]  }
  0x15   :  { %960 = vmatpush3.bf16.msra.mxu1 %v1079_v7  ;;  %v1095_v23 = vld [vmem:[#allocation2 + $0x90] sm:$0xff]   ;;  %v1096_v24 = vld [vmem:[#allocation2 + $0x48] sm:$0xff]   ;;  %v1100_v28 = vld [vmem:[#allocation2 + $0x40] sm:$0xff]  }
  0x16   :  { %961 = vmatprep.subr.bf16.mxu1 %v1082_v10  ;;  %v1097_v25 = vld [vmem:[#allocation2 + $0x8] sm:$0xff]   ;;  %v1101_v29 = vld [vmem:[#allocation2] sm:$0xff]   ;;  %v48_v36 = vld [vmem:[%s1335_s0 + $0x38] sm:$0xff] }
  0x17   :  { %940 = vmatpush3.bf16.msra.mxu0 %v1081_v9  ;;  %v1098_v26 = vld [vmem:[#allocation2 + $0xc8] sm:$0xff]   ;;  %v1102_v30 = vld [vmem:[#allocation2 + $0xc0] sm:$0xff]   ;;  %v1104_v38 = vld [vmem:[#allocation2 + $0x178] sm:$0xff]  }
  0x18   :  { %941 = vmatprep.subr.bf16.mxu0 %v1084_v12  ;;  %v1099_v27 = vld [vmem:[#allocation2 + $0x88] sm:$0xff]   ;;  %v49_v32 = vld [vmem:[%s1335_s0 + $0x40] sm:$0xff]  ;;  %v44_v39 = vld [vmem:[%s1335_s0 + $0x18] sm:$0xff] }
  0x19   :  { %962 = vmatpush3.bf16.msra.mxu1 %v1083_v11  ;;  %v42_v31 = vld [vmem:[%s1335_s0 + $0x8] sm:$0xff]  ;;  %v1103_v34 = vld [vmem:[#allocation2 + $0x80] sm:$0xff]   ;;  %v51_v40 = vld [vmem:[%s1335_s0 + $0x50] sm:$0xff] }
  0x1a   :  { %963 = vmatprep.subr.bf16.mxu1 %v1086_v14  ;;  %v56_v33 = vpack.c.bf16 %v49_v32, %v42_v31  ;;  %v41_v35 = vld [vmem:[%s1335_s0] sm:$0xff]  ;;  %v58_v41 = vpack.c.bf16 %v51_v40, %v44_v39  ;;  %v1105_v42 = vld [vmem:[#allocation2 + $0x138] sm:$0xff]   ;;  %v43_v44 = vld [vmem:[%s1335_s0 + $0x10] sm:$0xff] }
  0x1b   :  { %942 = vmatpush3.bf16.msra.mxu0 %v1085_v13  ;;  %v55_v37 = vpack.c.bf16 %v48_v36, %v41_v35  ;;  %v50_v45 = vld [vmem:[%s1335_s0 + $0x48] sm:$0xff]  ;;  %v1106_v47 = vld [vmem:[#allocation2 + $0x170] sm:$0xff]   ;;  %v1110_v51 = vld [vmem:[#allocation2 + $0x160] sm:$0xff]  }
  0x1c   :  { %943 = vmatprep.subr.bf16.mxu0 %v1088_v16  ;;  %497 = vmatprep.mubr.bf16.mxu0 %v56_v33  ;;  %v57_v46 = vpack.c.bf16 %v50_v45, %v43_v44  ;;  %v1107_v48 = vld [vmem:[#allocation2 + $0x130] sm:$0xff]   ;;  %v1108_v49 = vld [vmem:[#allocation2 + $0x168] sm:$0xff]   ;;  %v1111_v52 = vld [vmem:[#allocation2 + $0x120] sm:$0xff]  }
  0x1d   :  { %964 = vmatpush3.bf16.msra.mxu1 %v1087_v15  ;;  %538 = vmatprep.mubr.bf16.mxu1 %v58_v41  ;;  %v1109_v50 = vld [vmem:[#allocation2 + $0x128] sm:$0xff]   ;;  %v1112_v53 = vld [vmem:[#allocation2 + $0x158] sm:$0xff]   ;;  %v1114_v55 = vld [vmem:[#allocation2 + $0x150] sm:$0xff]  }
  0x1e   :  { %965 = vmatprep.subr.bf16.mxu1 %v1090_v18  ;;  %v1113_v54 = vld [vmem:[#allocation2 + $0x118] sm:$0xff]   ;;  %v1120_v56 = vld [vmem:[#allocation2 + $0x180] sm:$0xff]   ;;  %v46_v57 = vld [vmem:[%s1335_s0 + $0x28] sm:$0xff] }
  0x1f   :  { %944 = vmatpush3.bf16.msra.mxu0 %v1089_v17  ;;  %v1115_v58 = vld [vmem:[#allocation2 + $0x110] sm:$0xff]   ;;  %v1116_v59 = vld [vmem:[#allocation2 + $0x148] sm:$0xff]   ;;  %v53_v60 = vld [vmem:[%s1335_s0 + $0x60] sm:$0xff] }
  0x20   :  { %945 = vmatprep.subr.bf16.mxu0 %v1092_v20  ;;  %v60_v61 = vpack.c.bf16 %v53_v60, %v46_v57  ;;  %v47_v62 = vld [vmem:[%s1335_s0 + $0x30] sm:$0xff]  ;;  %v54_v63 = vld [vmem:[%s1335_s0 + $0x68] sm:$0xff]  ;;  %v1118_v2 = vld [vmem:[#allocation2 + $0x140] sm:$0xff]  }
  0x21   :  { %966 = vmatpush3.bf16.msra.mxu1 %v1091_v19  ;;  %v61_v0 = vpack.c.bf16 %v54_v63, %v47_v62  ;;  %v1117_v1 = vld [vmem:[#allocation2 + $0x108] sm:$0xff]   ;;  %v1119_v3 = vld [vmem:[#allocation2 + $0x100] sm:$0xff]   ;;  %v52_v5 = vld [vmem:[%s1335_s0 + $0x58] sm:$0xff] }
  0x22   :  { %967 = vmatprep.subr.bf16.mxu1 %v1094_v22  ;;  %v45_v4 = vld [vmem:[%s1335_s0 + $0x20] sm:$0xff]  ;;  %v1121_v7 = vld [vmem:[%s1338_s3 + $0x38] sm:$0xff]   ;;  %v1122_v8 = vld [vmem:[%s1338_s3 + $0x30] sm:$0xff]  }
  0x23   :  { %946 = vmatpush3.bf16.msra.mxu0 %v1093_v21  ;;  %v59_v6 = vpack.c.bf16 %v52_v5, %v45_v4  ;;  %v1123_v9 = vld [vmem:[%s1338_s3 + $0x28] sm:$0xff]   ;;  %v1124_v10 = vld [vmem:[%s1338_s3 + $0x20] sm:$0xff]   ;;  %v1125_v11 = vld [vmem:[%s1338_s3 + $0x18] sm:$0xff]  }
  0x24   :  { %947 = vmatprep.subr.bf16.mxu0 %v1096_v24  ;;  %v1126_v12 = vld [vmem:[%s1338_s3 + $0x10] sm:$0xff]   ;;  %v1127_v13 = vld [vmem:[%s1338_s3 + $0x8] sm:$0xff]   ;;  %v1128_v14 = vld [vmem:[%s1338_s3] sm:$0xff]  }
  0x25   :  { %968 = vmatpush3.bf16.msra.mxu1 %v1095_v23  ;;  %v1129_v15 = vld [vmem:[%s1340_s5 + $0x38] sm:$0xff]   ;;  %v1130_v16 = vld [vmem:[%s1340_s5 + $0x30] sm:$0xff]   ;;  %v1131_v17 = vld [vmem:[%s1340_s5 + $0x28] sm:$0xff]  }
  0x26   :  { %969 = vmatprep.subr.bf16.mxu1 %v1098_v26  ;;  %v1132_v18 = vld [vmem:[%s1340_s5 + $0x20] sm:$0xff]   ;;  %v1133_v19 = vld [vmem:[%s1340_s5 + $0x18] sm:$0xff]  }
  0x27   :  { %948 = vmatpush3.bf16.msra.mxu0 %v1097_v25  ;;  %v866_v32 = vld [vmem:[%s1337_s2] ss:$0 sm:$0xff] }
  0x28   :  { %949 = vmatprep.subr.bf16.mxu0 %v1100_v28  ;;  %v1136_v57 = vld [vmem:[%s1340_s5] sm:$0xff]  }
  0x29   :  { %970 = vmatpush3.bf16.msra.mxu1 %v1099_v27 }
  0x2a   :  { %971 = vmatprep.subr.bf16.mxu1 %v1102_v30 }
  0x2b   :  { %950 = vmatpush3.bf16.msra.mxu0 %v1101_v29 }
  0x2c   :  { %979 = vmatprep.subr.bf16.mxu0 %v1104_v38 }
  0x2d   :  { %972 = vmatpush3.bf16.msra.mxu1 %v1103_v34 }
  0x2e   :  { %1021 = vmatprep.subr.bf16.mxu1 %v1162_v43  ;;  %498 = vmatmul.mubr.bf16.vlgmr.msra.gmra.mxu0 %v55_v37 }
  0x2f   :  { %980 = vmatpush3.bf16.msra.mxu0 %v1105_v42  ;;  %579 = vmatprep.mubr.bf16.mxu0 %v60_v61 }
  0x30   :  { %539 = vmatmul.mubr.bf16.vlgmr.msra.gmra.mxu1 %v57_v46  ;;  %981 = vmatprep.subr.bf16.mxu0 %v1106_v47 }
  0x31   :  { %1023 = vmatprep.mubr.msk.bf16.mxu1 %vm1163_vm0, %v1162_v43  ;;  %1022 = vmatpush3.bf16.msra.mxu1 %v1120_v56  ;;  %v1135_v56 = vld [vmem:[%s1340_s5 + $0x8] sm:$0xff]  }
  0x32   :  { %1027 = vmatprep.subr.bf16.mxu1 %v1162_v43 }
  0x33   :  { %982 = vmatpush3.bf16.msra.mxu0 %v1107_v48 }
  0x34   :  { %983 = vmatprep.subr.bf16.mxu0 %v1108_v49 }
  0x37   :  { %984 = vmatpush3.bf16.msra.mxu0 %v1109_v50 }
  0x38   :  { %985 = vmatprep.subr.bf16.mxu0 %v1110_v51  ;;  %1024 = vmatmul.mubr.msk.bf16.vlgmr.msra.gmra.mxu1 %vm461_vm1, %v61_v0 }
  0x39   :  { %1043 = vmatprep.mubr.msk.bf16.mxu1 %vm1163_vm0, %v1162_v43  ;;  %1028 = vmatpush3.bf16.msra.mxu1 %v1121_v7 }
  0x3a   :  { %1029 = vmatprep.subr.bf16.mxu1 %v1162_v43 }
  0x3b   :  { %986 = vmatpush3.bf16.msra.mxu0 %v1111_v52 }
  0x3c   :  { %987 = vmatprep.subr.bf16.mxu0 %v1112_v53 }
  0x3d   :  { %1030 = vmatpush3.bf16.msra.mxu1 %v1122_v8 }
  0x3e   :  { %1031 = vmatprep.subr.bf16.mxu1 %v1162_v43 }
  0x3f   :  { %988 = vmatpush3.bf16.msra.mxu0 %v1113_v54 }
  0x40   :  { %989 = vmatprep.subr.bf16.mxu0 %v1114_v55  ;;  %v1134_v55 = vld [vmem:[%s1340_s5 + $0x10] sm:$0xff]  }
  0x41   :  { %1032 = vmatpush3.bf16.msra.mxu1 %v1123_v9 }
  0x42   :  { %1033 = vmatprep.subr.bf16.mxu1 %v1162_v43 }
  0x43   :  { %990 = vmatpush3.bf16.msra.mxu0 %v1115_v58  ;;  %v917_v58 = vld [vmem:[%s1339_s4] ss:$0 sm:$0xff] }
  0x44   :  { %991 = vmatprep.subr.bf16.mxu0 %v1116_v59 }
  0x45   :  { %1034 = vmatpush3.bf16.msra.mxu1 %v1124_v10 }
  0x46   :  { %1035 = vmatprep.subr.bf16.mxu1 %v1162_v43 }
  0x47   :  { %992 = vmatpush3.bf16.msra.mxu0 %v1117_v1 }
  0x48   :  { %993 = vmatprep.subr.bf16.mxu0 %v1118_v2 }
  0x49   :  { %1036 = vmatpush3.bf16.msra.mxu1 %v1125_v11 }
  0x4a   :  { %1037 = vmatprep.subr.bf16.mxu1 %v1162_v43 }
  0x4b   :  { %994 = vmatpush3.bf16.msra.mxu0 %v1119_v3 }
  0x4c   :  { %1047 = vmatprep.subr.bf16.mxu0 %v1162_v43 }
  0x4d   :  { %1038 = vmatpush3.bf16.msra.mxu1 %v1126_v12 }
  0x4e   :  { %580 = vmatmul.mubr.bf16.vlgmr.msra.gmra.mxu0 %v59_v6  ;;  %1039 = vmatprep.subr.bf16.mxu1 %v1162_v43 }
  0x4f   :  { %1063 = vmatprep.mubr.msk.bf16.mxu0 %vm1163_vm0, %v1162_v43  ;;  %1048 = vmatpush3.bf16.msra.mxu0 %v1129_v15 }
  0x50   :  { %1049 = vmatprep.subr.bf16.mxu0 %v1162_v43 }
  0x51   :  { %1040 = vmatpush3.bf16.msra.mxu1 %v1127_v13 }
  0x52   :  { %1041 = vmatprep.subr.bf16.mxu1 %v1162_v43 }
  0x53   :  { %1050 = vmatpush3.bf16.msra.mxu0 %v1130_v16 }
  0x54   :  { %1051 = vmatprep.subr.bf16.mxu0 %v1162_v43 }
  0x55   :  { %1042 = vmatpush3.bf16.msra.mxu1 %v1128_v14 }
  0x57   :  { %1052 = vmatpush3.bf16.msra.mxu0 %v1131_v17 }
  0x58   :  { %1053 = vmatprep.subr.bf16.mxu0 %v1162_v43 }
  0x5b   :  { %1054 = vmatpush3.bf16.msra.mxu0 %v1132_v18 }
  0x5c   :  { %1055 = vmatprep.subr.bf16.mxu0 %v1162_v43 }
  0x5f   :  { %1056 = vmatpush3.bf16.msra.mxu0 %v1133_v19 }
  0x60   :  { %1057 = vmatprep.subr.bf16.mxu0 %v1162_v43 }
  0x63   :  { %1058 = vmatpush3.bf16.msra.mxu0 %v1134_v55 }
  0x64   :  { %1059 = vmatprep.subr.bf16.mxu0 %v1162_v43 }
  0x67   :  { %1060 = vmatpush3.bf16.msra.mxu0 %v1135_v56 }
  0x68   :  { %1061 = vmatprep.subr.bf16.mxu0 %v1162_v43  ;;  %v926_v43 = vld [vmem:[%s1341_s6] ss:$0 sm:$0xff] }
  0x6b   :  { %1062 = vmatpush3.bf16.msra.mxu0 %v1136_v57 }
  0xee   :  { %v951_v23 = vpop.f32.mrf.mxu0 }
  0xf0   :  { %v973_v20 = vpop.f32.mrf.mxu1  ;;  %v952_v25 = vpop.f32.mrf.mxu0 }
  0xf1   :  { %v953_v31 = vadd.f32 %v952_v25, %v951_v23 }
  0xf2   :  { %v974_v21 = vpop.f32.mrf.mxu1  ;;  %v954_v28 = vpop.f32.mrf.mxu0 }
  0xf3   :  { %v500_v34 = vadd.f32 %v953_v31, %v866_v32  ;;  %v975_v35 = vadd.f32 %v974_v21, %v973_v20 }
  0xf4   :  { %v976_v22 = vpop.f32.mrf.mxu1  ;;  %v955_v33 = vpop.f32.mrf.mxu0 }
  0xf5   :  { %v956_v36 = vadd.f32 %v955_v33, %v954_v28  ;;  %v541_v39 = vadd.f32 %v975_v35, %v500_v34 }
  0xf6   :  { %v977_v24 = vpop.f32.mrf.mxu1 }
  0xf7   :  { %v503_v40 = vadd.f32 %v956_v36, %v866_v32  ;;  %v978_v41 = vadd.f32 %v977_v24, %v976_v22 }
  0xf8   :  { %v622_v26 = vpop.f32.mrf.mxu1 }
  0xf9   :  { %v544_v47 = vadd.f32 %v978_v41, %v503_v40 }
  0xfa   :  { %v1025_v27 = vpop.f32.mrf.mxu1 }
  0xfc   :  { %v625_v29 = vpop.f32.mrf.mxu1 }
  0xfe   :  { %v1026_v30 = vpop.f32.mrf.mxu1 }
 0x10e   :  { %v995_v37 = vpop.f32.mrf.mxu0 }
 0x110   :  { %v996_v38 = vpop.f32.mrf.mxu0 }
 0x111   :  { %v997_v42 = vadd.f32 %v996_v38, %v995_v37 }
 0x112   :  { %v998_v44 = vpop.f32.mrf.mxu0 }
 0x113   :  { %v582_v45 = vadd.f32 %v997_v42, %v541_v39 }
 0x114   :  { %v999_v46 = vpop.f32.mrf.mxu0 }
 0x115   :  { %v1000_v48 = vadd.f32 %v999_v46, %v998_v44  ;;  %v623_v49 = vadd.f32 %v622_v26, %v582_v45 }
 0x117   :  { %v585_v50 = vadd.f32 %v1000_v48, %v544_v47  ;;  %v629_v52 = vmax.f32 %v623_v49, 0.0 }
 0x119   :  { %v626_v51 = vadd.f32 %v625_v29, %v585_v50 }
 0x11b   :  { %v630_v53 = vmax.f32 %v626_v51, 0.0 }
 0x11d   :  { %v631_v54 = vpack.c.bf16 %v630_v53, %v629_v52 }
 0x11f   :  { %1044 = vmatmul.mubr.bf16.vlgmr.msra.gmra.mxu1 %v631_v54 }
 0x1df   :  { %v737_v59 = vpop.f32.mrf.mxu1 }
 0x1e0   :  { %v738_v61 = vadd.f32 %v917_v58, %v737_v59 }
 0x1e1   :  { %v1045_v60 = vpop.f32.mrf.mxu1 }
 0x1e2   :  { %v744_v1 = vmax.f32 %v738_v61, 0.0 }
 0x1e3   :  { %v740_v62 = vpop.f32.mrf.mxu1 }
 0x1e4   :  { %v741_v63 = vadd.f32 %v917_v58, %v740_v62 }
 0x1e5   :  { %v1046_v0 = vpop.f32.mrf.mxu1 }
 0x1e6   :  { %v745_v2 = vmax.f32 %v741_v63, 0.0 }
 0x1e8   :  { %v746_v3 = vpack.c.bf16 %v745_v2, %v744_v1 }
 0x1ea   :  { %1064 = vmatmul.mubr.bf16.vlgmr.msra.gmra.mxu0 %v746_v3 }
 0x2aa   :  { %v852_v4 = vpop.f32.mrf.mxu0 }
 0x2ab   :  { %v853_v5 = vadd.f32 %v926_v43, %v852_v4 }
 0x2ac   :  { %v1065_v6 = vpop.f32.mrf.mxu0 }
 0x2ad   :  { %859 = vst [vmem:[%s1342_s7] sm:$0xff] %v853_v5 }
 0x2ae   :  { %v855_v7 = vpop.f32.mrf.mxu0 }
 0x2af   :  { %v856_v8 = vadd.f32 %v926_v43, %v855_v7 }
 0x2b0   :  { %v1066_v9 = vpop.f32.mrf.mxu0 }
 0x2b1   :  { %860 = vst [vmem:[%s1342_s7 + $0x8] sm:$0xff] %v856_v8 }
 0x2b2   :  { %865 = vsyncpa [#allocation3], 1 }

</bundles_post_ra>
